<compile_context>
chip_gen: v6e
topology: v6e:2x2x1
jax: 0.10.0
libtpu: 0.0.40
codegen_flags: <defaults>
</compile_context>

<pallas_src>
import numpy as np
import jax
import jax.numpy as jnp
from jax.experimental import pallas as pl
from jax.experimental.pallas import tpu as pltpu


# ----------------------------------------------------------------------------
# Kernel 1: concat-fused 1x1 conv:  logits[b, :, s] = sum_k W_k^T @ X_k[b, :, s] + bias
#   refs = (x_0..x_{nf-1}, w_0..w_{nf-1}, bias, out)
#   x_k: (C_k, THW)   w_k: (nc, C_k)   bias: (nc, 1)   out: (nc, THW)
# ----------------------------------------------------------------------------
def _conv1x1_concat_kernel(*refs):
    o_ref = refs[-1]
    in_refs = refs[:-1]
    nf = (len(in_refs) - 1) // 2
    x_refs = in_refs[:nf]
    w_refs = in_refs[nf:2 * nf]
    b_ref = in_refs[2 * nf]

    acc = jnp.broadcast_to(b_ref[...].astype(jnp.float32), o_ref.shape)
    for x_r, w_r in zip(x_refs, w_refs):
        # Per-tile VPU cast to the weight dtype (bf16), f32 MXU accumulation.
        acc = acc + jnp.dot(w_r[...], x_r[...].astype(w_r.dtype),
                            preferred_element_type=jnp.float32)
    o_ref[...] = acc.astype(o_ref.dtype)


def conv1x1_concat(feats, weights, bias, *, out_dtype=jnp.bfloat16, hw_block=512):
    """feats: list of (B, C_k, HW); weights: list of (nc, C_k); bias: (nc, 1)."""
    B = feats[0].shape[0]
    hw = feats[0].shape[2]
    nc = weights[0].shape[0]

    # Spatial block: multiple of 128 (lane-dense stores) or the full extent.
    hw_block = max(128, (hw_block // 128) * 128)
    thw = hw if hw <= hw_block else hw_block

    in_specs = []
    for f in feats:
        ci = f.shape[1]
        # Full-channel block, THW spatial slice per grid step (lane axis = HW).
        in_specs.append(pl.BlockSpec((None, ci, thw), lambda b, s: (b, 0, s)))
    for w in weights:
        in_specs.append(pl.BlockSpec(w.shape, lambda b, s: (0, 0)))
    in_specs.append(pl.BlockSpec(bias.shape, lambda b, s: (0, 0)))

    return pl.pallas_call(
        _conv1x1_concat_kernel,
        out_shape=jax.ShapeDtypeStruct((B, nc, hw), out_dtype),
        grid_spec=pltpu.PrefetchScalarGridSpec(
            num_scalar_prefetch=0,
            grid=(B, pl.cdiv(hw, thw)),
            in_specs=in_specs,
            out_specs=pl.BlockSpec((None, nc, thw), lambda b, s: (b, 0, s)),
        ),
        compiler_params=pltpu.CompilerParams(
            dimension_semantics=("parallel", "parallel")),
    )(*feats, *weights, bias)


# ----------------------------------------------------------------------------
# Kernel 2: bilinear upsample, G maps per grid step:  out_g = Mh @ X_g @ Mw^T
#   x_ref: (G, H, W)  mh_ref: (OH, H)  mwt_ref: (W, OW)  o_ref: (G, OH, OW)
# All dots are bf16 x bf16 on the MXU with f32 accumulation.
# ----------------------------------------------------------------------------
def _bilinear_group_kernel(x_ref, mh_ref, mwt_ref, o_ref):
    mh = mh_ref[...]
    mwt = mwt_ref[...]
    g_count = x_ref.shape[0]

    def body(g, carry):
        xg = x_ref[g].astype(mh.dtype)                               # (H, W)
        t = jnp.dot(mh, xg, preferred_element_type=jnp.float32)      # (OH, W) f32
        o_ref[g] = jnp.dot(t.astype(mwt.dtype), mwt,
                           preferred_element_type=jnp.float32).astype(o_ref.dtype)
        return carry

    # fori_loop (fully unrolled) bounds the live range of the (OH, W)
    # temporaries while keeping LLO scheduling visibility.
    jax.lax.fori_loop(0, g_count, body, None, unroll=True)


def bilinear_upsample(maps, mh, mwt, *, group_size=8, out_dtype=jnp.bfloat16):
    nmaps, h, w = maps.shape
    oh, ow = mh.shape[0], mwt.shape[1]

    out_bytes = jnp.dtype(out_dtype).itemsize
    in_bytes = jnp.dtype(maps.dtype).itemsize
    mat_bytes = jnp.dtype(mh.dtype).itemsize

    def vmem_needed(g):
        # Double-buffered in/out blocks plus the resident interp matrices.
        return (2 * g * oh * ow * out_bytes
                + 2 * g * h * w * in_bytes
                + 2 * (oh * h + w * ow) * mat_bytes)

    # Keep the blocks well inside every generation's VMEM (v7x: 64 MiB phys).
    block_budget = 40 << 20
    g = max(1, min(group_size, nmaps))
    while g > 1 and vmem_needed(g) > block_budget:
        g -= 1
    vmem_limit = int(min(max(vmem_needed(g) + (8 << 20), 16 << 20), 48 << 20))

    return pl.pallas_call(
        _bilinear_group_kernel,
        out_shape=jax.ShapeDtypeStruct((nmaps, oh, ow), out_dtype),
        grid_spec=pltpu.PrefetchScalarGridSpec(
            num_scalar_prefetch=0,
            # cdiv grid: partial tail block (reads padded, OOB writes dropped),
            # so g stays large even when nmaps (= B * nc) is not divisible.
            grid=(pl.cdiv(nmaps, g),),
            in_specs=[
                pl.BlockSpec((g, h, w), lambda i: (i, 0, 0)),
                pl.BlockSpec((oh, h), lambda i: (0, 0)),
                pl.BlockSpec((w, ow), lambda i: (0, 0)),
            ],
            out_specs=pl.BlockSpec((g, oh, ow), lambda i: (i, 0, 0)),
        ),
        compiler_params=pltpu.CompilerParams(
            dimension_semantics=("parallel",),
            vmem_limit_bytes=vmem_limit,
        ),
    )(maps, mh, mwt)


# ----------------------------------------------------------------------------
# PyTorch-exact bilinear (align_corners=False) interpolation matrix (built in
# f32; the kernel consumes a bf16 copy, the f32 copy is kept for reference).
# ----------------------------------------------------------------------------
def bilinear_matrix(in_size, out_size):
    scale = in_size / out_size
    dst = np.arange(out_size, dtype=np.float64)
    src = (dst + 0.5) * scale - 0.5
    src = np.maximum(src, 0.0)   # PyTorch clamps negative source coords to 0.
    idx0 = np.clip(np.floor(src).astype(np.int64), 0, in_size - 1)
    idx1 = np.minimum(idx0 + 1, in_size - 1)   # upper taps collapse at the edge
    lam1 = src - idx0
    lam0 = 1.0 - lam1
    m = np.zeros((out_size, in_size), dtype=np.float32)
    m[np.arange(out_size), idx0] += lam0
    m[np.arange(out_size), idx1] += lam1
    return jnp.asarray(m)


# ----------------------------------------------------------------------------
# Wrapper mirroring DINOv2Segmentation.forward (decode path).
# ----------------------------------------------------------------------------
class DINOv2SegmentationPallas:
    def __init__(self, layer_channels, num_classes, tokenH, tokenW, patch=14,
                 key=None, compute_dtype=jnp.bfloat16, out_dtype=jnp.bfloat16):
        self.layer_channels = tuple(layer_channels)
        self.C = int(sum(layer_channels))
        self.nc = num_classes
        self.H, self.W, self.patch = tokenH, tokenW, patch
        self.compute_dtype = compute_dtype
        self.out_dtype = out_dtype   # bf16: halves the dominant upsample HBM writeback

        kw, kb = jax.random.split(key, 2)
        bound = float(1.0 / np.sqrt(self.C))
        # Conv2d(C, nc, (1,1)) weight, stored as (nc, C) and split along the
        # input-channel axis so the torch.cat is fused into the K accumulation.
        w_full = jax.random.uniform(kw, (num_classes, self.C), jnp.float32, -bound, bound)
        splits = np.cumsum(self.layer_channels)[:-1].tolist()
        self.w_blocks = [w.astype(compute_dtype) for w in jnp.split(w_full, splits, axis=1)]
        self.b = jax.random.uniform(kb, (num_classes, 1), jnp.float32, -bound, bound)

        self.mh_f32 = bilinear_matrix(tokenH, tokenH * patch)        # (OH, H)
        self.mwt_f32 = bilinear_matrix(tokenW, tokenW * patch).T     # (W, OW)
        self.mh = self.mh_f32.astype(compute_dtype)
        self.mwt = self.mwt_f32.astype(compute_dtype)

    def __call__(self, features):
        # features: list of NCHW intermediate-layer maps (as from the backbone).
        B, _, H, W = features[0].shape
        assert (H, W) == (self.H, self.W)
        assert sum(f.shape[1] for f in features) == self.C
        # NCHW kept as-is: only free contiguous reshapes.  No wrapper-side
        # dtype cast — the conv kernel casts each feature tile on the VPU, so
        # the feature HBM traffic happens exactly once.
        feats = [f.reshape(B, f.shape[1], H * W) for f in features]
        logits = conv1x1_concat(feats, self.w_blocks, self.b,
                                out_dtype=self.compute_dtype)         # (B, nc, HW) bf16
        maps = logits.reshape(B * self.nc, H, W)                      # free reshape
        up = bilinear_upsample(maps, self.mh, self.mwt, out_dtype=self.out_dtype)
        return up.reshape(B, self.nc, H * self.patch, W * self.patch)


if __name__ == "__main__":
    key = jax.random.PRNGKey(0)
    # Small shapes consistent with the module: 4 intermediate layers, tokenH=tokenW=8
    # (stand-ins for 4 x 384 channels at 46x46 tokens, 19 classes).  num_classes=5
    # makes nmaps=10 so the cdiv/partial-tail upsample grid path is exercised.
    B, H, W = 2, 8, 8
    n_layers, c_per_layer = 4, 8
    num_classes = 5
    kf, kmodel = jax.random.split(key)
    features = [
        jax.random.normal(jax.random.fold_in(kf, i), (B, c_per_layer, H, W), jnp.float32)
        for i in range(n_layers)
    ]

    model = DINOv2SegmentationPallas(
        layer_channels=(c_per_layer,) * n_layers, num_classes=num_classes,
        tokenH=H, tokenW=W, patch=14, key=kmodel)

    out = jax.block_until_ready(model(features))
    assert out.shape == (B, num_classes, H * 14, W * 14)
    assert out.dtype == model.out_dtype

    # Pure-JAX f32 reference of the same math (bf16-rounded operands where the
    # kernel rounds them).  Tolerance accounts for bf16 logits / bf16 interp
    # matrices / bf16 output.
    feats_r = [f.astype(jnp.bfloat16).astype(jnp.float32) for f in features]
    x = jnp.concatenate(feats_r, axis=1)                                  # (B, C, H, W)
    w_ref = jnp.concatenate([w.astype(jnp.float32) for w in model.w_blocks], axis=1)
    ref_logits = jnp.einsum('bchw,nc->bnhw', x, w_ref,
                            precision=jax.lax.Precision.HIGHEST) + model.b.reshape(1, -1, 1, 1)
    ref = jnp.einsum('qh,bnhw,wp->bnqp', model.mh_f32, ref_logits, model.mwt_f32,
                     precision=jax.lax.Precision.HIGHEST)
    out_f32 = out.astype(jnp.float32)
    max_err = float(jnp.max(jnp.abs(out_f32 - ref)))
    assert jnp.allclose(out_f32, ref, atol=6e-2, rtol=6e-2), max_err

    print("KERNEL_OK")
</pallas_src>

<mosaic_0001>
module attributes {stable_mosaic.version = 11 : i64} {
  func.func @_conv1x1_concat_kernel(%arg0: i32, %arg1: i32, %arg2: memref<1x8x64xf32, #tpu.memory_space<vmem>>, %arg3: memref<1x8x64xf32, #tpu.memory_space<vmem>>, %arg4: memref<1x8x64xf32, #tpu.memory_space<vmem>>, %arg5: memref<1x8x64xf32, #tpu.memory_space<vmem>>, %arg6: memref<5x8xbf16, #tpu.memory_space<vmem>>, %arg7: memref<5x8xbf16, #tpu.memory_space<vmem>>, %arg8: memref<5x8xbf16, #tpu.memory_space<vmem>>, %arg9: memref<5x8xbf16, #tpu.memory_space<vmem>>, %arg10: memref<5x1xf32, #tpu.memory_space<vmem>>, %arg11: memref<1x5x64xbf16, #tpu.memory_space<vmem>>) attributes {dimension_semantics = [#tpu.dimension_semantics<parallel>, #tpu.dimension_semantics<parallel>], iteration_bounds = array<i64: 2, 1>, scalar_prefetch = 0 : i64, scratch_operands = 0 : i64, tpu.core_type = #tpu.core_type<tc>, window_params = [{transform_indices = @transform_0, window_bounds = array<i64: 1, 8, 64>}, {transform_indices = @transform_1, window_bounds = array<i64: 1, 8, 64>}, {transform_indices = @transform_2, window_bounds = array<i64: 1, 8, 64>}, {transform_indices = @transform_3, window_bounds = array<i64: 1, 8, 64>}, {pipeline_mode = #tpu.pipeline_mode<synchronous>, transform_indices = @transform_4, window_bounds = array<i64: 5, 8>}, {pipeline_mode = #tpu.pipeline_mode<synchronous>, transform_indices = @transform_5, window_bounds = array<i64: 5, 8>}, {pipeline_mode = #tpu.pipeline_mode<synchronous>, transform_indices = @transform_6, window_bounds = array<i64: 5, 8>}, {pipeline_mode = #tpu.pipeline_mode<synchronous>, transform_indices = @transform_7, window_bounds = array<i64: 5, 8>}, {pipeline_mode = #tpu.pipeline_mode<synchronous>, transform_indices = @transform_8, window_bounds = array<i64: 5, 1>}, {transform_indices = @transform_9, window_bounds = array<i64: 1, 5, 64>}]} {
    %c0 = arith.constant 0 : index
    %c0_0 = arith.constant 0 : index
    %0 = vector.load %arg10[%c0, %c0_0] : memref<5x1xf32, #tpu.memory_space<vmem>>, vector<5x1xf32>
    %1 = vector.shape_cast %0 : vector<5x1xf32> to vector<5x1xf32>
    %2 = vector.broadcast %1 : vector<5x1xf32> to vector<5x64xf32>
    %c0_1 = arith.constant 0 : index
    %c0_2 = arith.constant 0 : index
    %3 = vector.load %arg6[%c0_1, %c0_2] : memref<5x8xbf16, #tpu.memory_space<vmem>>, vector<5x8xbf16>
    %c0_3 = arith.constant 0 : index
    %c0_4 = arith.constant 0 : index
    %c0_5 = arith.constant 0 : index
    %4 = vector.load %arg2[%c0_3, %c0_4, %c0_5] : memref<1x8x64xf32, #tpu.memory_space<vmem>>, vector<1x8x64xf32>
    %5 = vector.shape_cast %4 : vector<1x8x64xf32> to vector<8x64xf32>
    %6 = arith.truncf %5 : vector<8x64xf32> to vector<8x64xbf16>
    %cst = arith.constant dense<0.000000e+00> : vector<5x64xf32>
    %7 = tpu.matmul %3, %6, %cst {dimension_numbers = #tpu.dot_dimension_numbers<[1], [0], [0], [1], [0, 0, 1, 1], [], []>} : vector<5x8xbf16>, vector<8x64xbf16>, vector<5x64xf32> -> vector<5x64xf32>
    %8 = arith.addf %2, %7 : vector<5x64xf32>
    %c0_6 = arith.constant 0 : index
    %c0_7 = arith.constant 0 : index
    %9 = vector.load %arg7[%c0_6, %c0_7] : memref<5x8xbf16, #tpu.memory_space<vmem>>, vector<5x8xbf16>
    %c0_8 = arith.constant 0 : index
    %c0_9 = arith.constant 0 : index
    %c0_10 = arith.constant 0 : index
    %10 = vector.load %arg3[%c0_8, %c0_9, %c0_10] : memref<1x8x64xf32, #tpu.memory_space<vmem>>, vector<1x8x64xf32>
    %11 = vector.shape_cast %10 : vector<1x8x64xf32> to vector<8x64xf32>
    %12 = arith.truncf %11 : vector<8x64xf32> to vector<8x64xbf16>
    %cst_11 = arith.constant dense<0.000000e+00> : vector<5x64xf32>
    %13 = tpu.matmul %9, %12, %cst_11 {dimension_numbers = #tpu.dot_dimension_numbers<[1], [0], [0], [1], [0, 0, 1, 1], [], []>} : vector<5x8xbf16>, vector<8x64xbf16>, vector<5x64xf32> -> vector<5x64xf32>
    %14 = arith.addf %8, %13 : vector<5x64xf32>
    %c0_12 = arith.constant 0 : index
    %c0_13 = arith.constant 0 : index
    %15 = vector.load %arg8[%c0_12, %c0_13] : memref<5x8xbf16, #tpu.memory_space<vmem>>, vector<5x8xbf16>
    %c0_14 = arith.constant 0 : index
    %c0_15 = arith.constant 0 : index
    %c0_16 = arith.constant 0 : index
    %16 = vector.load %arg4[%c0_14, %c0_15, %c0_16] : memref<1x8x64xf32, #tpu.memory_space<vmem>>, vector<1x8x64xf32>
    %17 = vector.shape_cast %16 : vector<1x8x64xf32> to vector<8x64xf32>
    %18 = arith.truncf %17 : vector<8x64xf32> to vector<8x64xbf16>
    %cst_17 = arith.constant dense<0.000000e+00> : vector<5x64xf32>
    %19 = tpu.matmul %15, %18, %cst_17 {dimension_numbers = #tpu.dot_dimension_numbers<[1], [0], [0], [1], [0, 0, 1, 1], [], []>} : vector<5x8xbf16>, vector<8x64xbf16>, vector<5x64xf32> -> vector<5x64xf32>
    %20 = arith.addf %14, %19 : vector<5x64xf32>
    %c0_18 = arith.constant 0 : index
    %c0_19 = arith.constant 0 : index
    %21 = vector.load %arg9[%c0_18, %c0_19] : memref<5x8xbf16, #tpu.memory_space<vmem>>, vector<5x8xbf16>
    %c0_20 = arith.constant 0 : index
    %c0_21 = arith.constant 0 : index
    %c0_22 = arith.constant 0 : index
    %22 = vector.load %arg5[%c0_20, %c0_21, %c0_22] : memref<1x8x64xf32, #tpu.memory_space<vmem>>, vector<1x8x64xf32>
    %23 = vector.shape_cast %22 : vector<1x8x64xf32> to vector<8x64xf32>
    %24 = arith.truncf %23 : vector<8x64xf32> to vector<8x64xbf16>
    %cst_23 = arith.constant dense<0.000000e+00> : vector<5x64xf32>
    %25 = tpu.matmul %21, %24, %cst_23 {dimension_numbers = #tpu.dot_dimension_numbers<[1], [0], [0], [1], [0, 0, 1, 1], [], []>} : vector<5x8xbf16>, vector<8x64xbf16>, vector<5x64xf32> -> vector<5x64xf32>
    %26 = arith.addf %20, %25 : vector<5x64xf32>
    %27 = arith.truncf %26 : vector<5x64xf32> to vector<5x64xbf16>
    %c0_24 = arith.constant 0 : index
    %c0_25 = arith.constant 0 : index
    %c0_26 = arith.constant 0 : index
    %28 = vector.load %arg11[%c0_24, %c0_25, %c0_26] : memref<1x5x64xbf16, #tpu.memory_space<vmem>>, vector<1x5x64xbf16>
    %29 = vector.shape_cast %28 : vector<1x5x64xbf16> to vector<5x64xbf16>
    %30 = vector.shape_cast %27 : vector<5x64xbf16> to vector<1x5x64xbf16>
    tpu.vector_store %arg11[%c0_24, %c0_25, %c0_26], %30 {strides = array<i32>} : memref<1x5x64xbf16, #tpu.memory_space<vmem>>, vector<1x5x64xbf16>,
    return
  }
  func.func @transform_0(%arg0: i32, %arg1: i32) -> (i32, i32, i32) {
    %c0_i32 = arith.constant 0 : i32
    %c0_i32_0 = arith.constant 0 : i32
    return %arg0, %c0_i32, %arg1 : i32, i32, i32
  }
  func.func @transform_1(%arg0: i32, %arg1: i32) -> (i32, i32, i32) {
    %c0_i32 = arith.constant 0 : i32
    %c0_i32_0 = arith.constant 0 : i32
    return %arg0, %c0_i32, %arg1 : i32, i32, i32
  }
  func.func @transform_2(%arg0: i32, %arg1: i32) -> (i32, i32, i32) {
    %c0_i32 = arith.constant 0 : i32
    %c0_i32_0 = arith.constant 0 : i32
    return %arg0, %c0_i32, %arg1 : i32, i32, i32
  }
  func.func @transform_3(%arg0: i32, %arg1: i32) -> (i32, i32, i32) {
    %c0_i32 = arith.constant 0 : i32
    %c0_i32_0 = arith.constant 0 : i32
    return %arg0, %c0_i32, %arg1 : i32, i32, i32
  }
  func.func @transform_4(%arg0: i32, %arg1: i32) -> (i32, i32) {
    %c0_i32 = arith.constant 0 : i32
    %c0_i32_0 = arith.constant 0 : i32
    %c0_i32_1 = arith.constant 0 : i32
    return %c0_i32, %c0_i32_0 : i32, i32
  }
  func.func @transform_5(%arg0: i32, %arg1: i32) -> (i32, i32) {
    %c0_i32 = arith.constant 0 : i32
    %c0_i32_0 = arith.constant 0 : i32
    %c0_i32_1 = arith.constant 0 : i32
    return %c0_i32, %c0_i32_0 : i32, i32
  }
  func.func @transform_6(%arg0: i32, %arg1: i32) -> (i32, i32) {
    %c0_i32 = arith.constant 0 : i32
    %c0_i32_0 = arith.constant 0 : i32
    %c0_i32_1 = arith.constant 0 : i32
    return %c0_i32, %c0_i32_0 : i32, i32
  }
  func.func @transform_7(%arg0: i32, %arg1: i32) -> (i32, i32) {
    %c0_i32 = arith.constant 0 : i32
    %c0_i32_0 = arith.constant 0 : i32
    %c0_i32_1 = arith.constant 0 : i32
    return %c0_i32, %c0_i32_0 : i32, i32
  }
  func.func @transform_8(%arg0: i32, %arg1: i32) -> (i32, i32) {
    %c0_i32 = arith.constant 0 : i32
    %c0_i32_0 = arith.constant 0 : i32
    %c0_i32_1 = arith.constant 0 : i32
    return %c0_i32, %c0_i32_0 : i32, i32
  }
  func.func @transform_9(%arg0: i32, %arg1: i32) -> (i32, i32, i32) {
    %c0_i32 = arith.constant 0 : i32
    %c0_i32_0 = arith.constant 0 : i32
    return %arg0, %c0_i32, %arg1 : i32, i32, i32
  }
}

</mosaic_0001>

<bundles_post_ra>
// kernel: tpu_custom_call.1
= control target key start
LH: loop header
LB: loop body
LE: loop exit
PB: predicated region body
PF: predicated region fallthrough
CT: control target
= control target key end

     0   :  { %s1404_s0 = inlined_call_operand.hbm [shape: f32[2,8,64], index: 0, kind: input, shape index: {}]   ;;  %s1405_s1 = inlined_call_operand.hbm [shape: f32[2,8,64], index: 1, kind: input, shape index: {}]   ;;  %s1406_s2 = inlined_call_operand.hbm [shape: f32[2,8,64], index: 2, kind: input, shape index: {}]   ;;  %s1407_s3 = inlined_call_operand.hbm [shape: f32[2,8,64], index: 3, kind: input, shape index: {}]   ;;  %s1408_s4 = inlined_call_operand.vmem [shape: bf16[5,8], index: 4, kind: input, shape index: {}]   ;;  %s1409_s5 = inlined_call_operand.vmem [shape: bf16[5,8], index: 5, kind: input, shape index: {}]   ;;  %s1410_s6 = inlined_call_operand.vmem [shape: bf16[5,8], index: 6, kind: input, shape index: {}]   ;;  %s1411_s7 = inlined_call_operand.vmem [shape: bf16[5,8], index: 7, kind: input, shape index: {}]   ;;  %s1412_s8 = inlined_call_operand.vmem [shape: f32[5,1], index: 8, kind: input, shape index: {}]   ;;  %s1413_s9 = inlined_call_operand.vmem [shape: bf16[2,5,64], index: 9, kind: output, shape index: {}]  }
   0x1   :  { %1417 = sst [smem:[#allocation15_spill]] %s1404_s0 }
   0x2   :  { %1418 = sst [smem:[#allocation16_spill]] %s1405_s1 }
   0x3   :  { %14 = vsyncpa [#allocation3], 0 }
   0x4   :  { %16 = vsyncpa [#allocation3 + $0x1], 0 }
   0x5   :  { %17 = vsyncpa [#allocation5], 0 }
   0x6   :  { %19 = vsyncpa [#allocation5 + $0x1], 0 }
   0x7   :  { %20 = vsyncpa [#allocation8], 0 }
   0x8   :  { %22 = vsyncpa [#allocation8 + $0x1], 0  ;;  %s1216_s30 = smov 0   ;;  %s1218_s10 = smov 0  }
   0x9   :  { %s1220_s11 = smov 0   ;;  %s1222_s12 = smov 0  }
   0xa   :  { %s1224_s13 = smov 0   ;;  %s1226_s14 = smov 0  }
   0xb LB: > { %1419 = sst [smem:[#allocation12_spill]] %s1153_s13  ;;  %s1414_s15 = sadd.s32 4294967295, %s1157_s14   ;;  %s1157_s14 = sphi %s1226_s14, %s28_s14   ;;  %s1153_s13 = sphi %s1224_s13, %s1430_s13   ;;  %s1149_s12 = sphi %s1222_s12, %s1434_s12   ;;  %s1145_s11 = sphi %s1220_s11, %s1433_s11   ;;  %s1141_s10 = sphi %s1218_s10, %s1432_s10   ;;  %s1137_s30 = sphi %s1216_s30, %s1431_s30  }
   0xc   : > { %s40_s16 = sadd.s32 1, %s1153_s13  ;;  %s49_s17 = sadd.s32 1, %s1145_s11 }
   0xd   : > { %p42_p0 = scmp.ge.s32.totalorder %s40_s16, 2  ;;  %p56_p1 = scmp.ne.s32.totalorder %s1145_s11, %s1141_s10 }
   0xe   : > { %p57_p2 = scmp.eq.s32.totalorder %s1157_s14, 0  ;;  %p62_p4 = scmp.ne.s32.totalorder %s1141_s10, %s1137_s30 }
   0xf   : > { %s1436_s16 = smov (%p42_p0, %s40_s16), 0  ;;  %p63_p5 = scmp.eq.s32.totalorder %s1414_s15, 0 }
  0x10   : > { %1420 = sst [smem:[#allocation13_spill]] %s1436_s16  ;;  %p58_p3 = por %p57_p2, %p56_p1 }
  0x11   : > { %s44_s18 = ssub.s32 %s1153_s13, %s1436_s16  ;;  %p1257_p7 = por %p63_p5, %p62_p4 }
  0x12   : > { %p47_p6 = scmp.eq.s32.totalorder %s44_s18, 0  ;;  %p934_p8 = scmp.lt.s32.totalorder %s1157_s14, 2 }
  0x13   : > { %s1266_s21 = sand.u32 1, %s1145_s11   ;;  %s1269_s22 = sshll.u32 %s1153_s13, 7 }
  0x14   : > { %s1263_s20 = scalar_select %p47_p6, %s1145_s11, %s49_s17  }
  0x15   : > { %s1272_s23 = sshll.u32 %s1266_s21, 3  ;;  %p1274_p9 = pnand %p934_p8, %p58_p3 }
  0x16   : > { %1422 = sst [smem:[#allocation14_spill]] %s1263_s20  ;;  %s337_s25 = sand.u32 1, %s1157_s14  }
  0x17   : > { %s1424_s1 = sld [smem:[#allocation16_spill]]  ;;  %s341_s29 = scalar_lea.vmem [#allocation4], %s1272_s23 }
  0x18   : > { %s349_s30 = sshll.u32 %s341_s29, 4  ;;  %p869_p10 = scmp.ge.s32.totalorder %s1157_s14, 1  ;;  %s350_s30 = int_to_ptr.vmem [resolvable:$true] %s349_s30 }
  0x19   : > { %s1285_s17 = scalar_lea.sflag [#allocation5], %s337_s25  ;;  %p989_p11 = pneg %p1274_p9 }
  0x1a   : > { %s1000_s18 = scalar_lea.vmem %s350_s30, 128  ;;  %s1159_s15 = smov [#allocation4]  }
  0x1b   : > { %p1001_p12 = scmp.ne.s32.totalorder %s350_s30, %s1000_s18  ;;  %s1005_s16 = sshll.u32 %s1159_s15, 4  ;;  %s1006_s16 = int_to_ptr.vmem [resolvable:$false] %s1005_s16 }
  0x1c   : > { %s1007_s13 = scalar_lea.vmem %s1006_s16, 256  ;;  %p1008_p1 = scmp.lt.s32.totalorder %s350_s30, %s1006_s16 }
  0x1d   : > { %s347_s28 = scalar_lea.hbm %s1424_s1, %s1269_s22  ;;  %p1003_p13 = pnand %p1001_p12, %p989_p11 }
  0x1e   : > { %p1009_p2 = scmp.lt.s32.totalorder %s1007_s13, %s1000_s18 }
  0x1f   : > { %p1004_p0 = pneg %p1003_p13 }
  0x20   : > { %p1010_p3 = por %p1009_p2, %p1008_p1 }
  0x22   : > { %p1011_p4 = pnand %p1010_p3, %p1004_p0 }
  0x24   : > { %1014 = shalt.err (!%p1011_p4)
}
  0x25   : > { %927 = dma.hbm_to_vmem [thread:$0]  (!%p1274_p9), %s347_s28, 128, %s350_s30, %s1285_s17  }
  0x26   : > { %p392_p5 = scmp.lt.s32.totalorder %s1157_s14, 3  ;;  %s1426_s0 = sld [smem:[#allocation15_spill]] }
  0x27   : > { %s322_s26 = scalar_lea.vmem [#allocation2], %s1272_s23  ;;  %s319_s29 = scalar_lea.sflag [#allocation3], %s1266_s21 }
  0x28   : > { %p1298_p6 = pnand %p869_p10, %p392_p5  ;;  %s330_s27 = sshll.u32 %s322_s26, 4  ;;  %s331_s27 = int_to_ptr.vmem [resolvable:$true] %s330_s27 }
  0x29   : > { %s1028_s18 = scalar_lea.vmem %s331_s27, 128  ;;  %s1160_s28 = smov [#allocation2]  }
  0x2a   : > { %p1029_p8 = scmp.ne.s32.totalorder %s331_s27, %s1028_s18  ;;  %s1033_s30 = sshll.u32 %s1160_s28, 4  ;;  %s1034_s30 = int_to_ptr.vmem [resolvable:$false] %s1033_s30 }
  0x2b   : > { %s1035_s1 = scalar_lea.vmem %s1034_s30, 256  ;;  %p1036_p10 = scmp.lt.s32.totalorder %s331_s27, %s1034_s30 }
  0x2c   : > { %s328_s25 = scalar_lea.hbm %s1426_s0, %s1269_s22  ;;  %p1031_p12 = pnand %p1029_p8, %p989_p11 }
  0x2d   : > { %p1037_p0 = scmp.lt.s32.totalorder %s1035_s1, %s1028_s18 }
  0x2e   : > { %p1032_p13 = pneg %p1031_p12 }
  0x2f   : > { %p1038_p1 = por %p1037_p0, %p1036_p10 }
  0x31   : > { %p1039_p2 = pnand %p1038_p1, %p1032_p13 }
  0x33   : > { %1042 = shalt.err (!%p1039_p2)
}
  0x34   : > { %924 = dma.hbm_to_vmem [thread:$0]  (!%p1274_p9), %s328_s25, 128, %s331_s27, %s319_s29  }
  0x35   : > { %s366_s26 = scalar_lea.hbm %s1406_s2, %s1269_s22  ;;  %s360_s0 = scalar_lea.vmem [#allocation6], %s1272_s23 }
  0x36   : > { %s368_s20 = sshll.u32 %s360_s0, 4  ;;  %s1161_s1 = smov [#allocation6]   ;;  %s369_s20 = int_to_ptr.vmem [resolvable:$true] %s368_s20 }
  0x37   : > { %s1056_s28 = scalar_lea.vmem %s369_s20, 128  ;;  %s1061_s18 = sshll.u32 %s1161_s1, 4  ;;  %s1062_s18 = int_to_ptr.vmem [resolvable:$false] %s1061_s18 }
  0x38   : > { %p1057_p3 = scmp.ne.s32.totalorder %s369_s20, %s1056_s28  ;;  %s1063_s30 = scalar_lea.vmem %s1062_s18, 256 }
  0x39   : > { %p1064_p8 = scmp.lt.s32.totalorder %s369_s20, %s1062_s18  ;;  %p1065_p12 = scmp.lt.s32.totalorder %s1063_s30, %s1056_s28 }
  0x3a   : > { %p1059_p4 = pnand %p1057_p3, %p989_p11 }
  0x3b   : > { %p1066_p13 = por %p1065_p12, %p1064_p8 }
  0x3c   : > { %p1060_p5 = pneg %p1059_p4 }
  0x3e   : > { %p1067_p10 = pnand %p1066_p13, %p1060_p5 }
  0x40   : > { %1070 = shalt.err (!%p1067_p10)
}
  0x41   : > { %930 = dma.hbm_to_vmem [thread:$0]  (!%p1274_p9), %s366_s26, 128, %s369_s20, %s1285_s17  }
  0x42   : > { %s385_s27 = scalar_lea.hbm %s1407_s3, %s1269_s22  ;;  %s379_s29 = scalar_lea.vmem [#allocation7], %s1272_s23 }
  0x43   : > { %s387_s13 = sshll.u32 %s379_s29, 4  ;;  %s376_s16 = scalar_lea.sflag [#allocation8], %s1266_s21  ;;  %s388_s13 = int_to_ptr.vmem [resolvable:$true] %s387_s13 }
  0x44   : > { %s1084_s28 = scalar_lea.vmem %s388_s13, 128  ;;  %s1162_s1 = smov [#allocation7]  }
  0x45   : > { %p1085_p0 = scmp.ne.s32.totalorder %s388_s13, %s1084_s28  ;;  %s1089_s18 = sshll.u32 %s1162_s1, 4  ;;  %s1090_s18 = int_to_ptr.vmem [resolvable:$false] %s1089_s18 }
  0x46   : > { %s1091_s30 = scalar_lea.vmem %s1090_s18, 256  ;;  %p1092_p3 = scmp.lt.s32.totalorder %s388_s13, %s1090_s18 }
  0x47   : > { %p1087_p1 = pnand %p1085_p0, %p989_p11  ;;  %p1093_p4 = scmp.lt.s32.totalorder %s1091_s30, %s1084_s28 }
  0x49   : > { %p1088_p2 = pneg %p1087_p1  ;;  %p1094_p5 = por %p1093_p4, %p1092_p3 }
  0x4b   : > { %p1095_p8 = pnand %p1094_p5, %p1088_p2 }
  0x4d   : > { %1098 = shalt.err (!%p1095_p8)
}
  0x4e   : > { %933 = dma.hbm_to_vmem [thread:$0]  (!%p1274_p9), %s385_s27, 128, %s388_s13, %s376_s16  }
  0x4f   : > { %396 = sbr.rel (%p1298_p6) target bundleno = 308 (0x134), region = 56  ;;  %s398_s20 = sand.u32 (!%p1298_p6), 1, %s1141_s10  }
  0x50   : > { %s1338_s21 = sshll.u32 (!%p1298_p6), %s398_s20, 3  ;;  %s399_s22 = scalar_lea.sflag (!%p1298_p6), [#allocation3], %s398_s20 }
  0x51   : > { %s402_s23 = scalar_lea.vmem (!%p1298_p6), [#allocation2], %s1338_s21 }
  0x54   : > { %1124 = dma.done.wait (%p1257_p7), %s399_s22, 128  }
  0x55   : > { %1126 = vsyncadd (%p1257_p7), %s399_s22, 4294967168  ;;  %s1427_s17 = sadd.s32 4294967295, %s1157_s14   ;;  %s411_s26 = scalar_lea.vmem [#allocation4], %s1338_s21 }
  0x56   : > { %s407_s24 = sand.u32 1, %s1427_s17  }
  0x57   : > { %s408_s15 = scalar_lea.sflag [#allocation5], %s407_s24 }
  0x58   : > { %1128 = dma.done.wait (%p1257_p7), %s408_s15, 256  }
  0x59   : > { %1130 = vsyncadd (%p1257_p7), %s408_s15, 4294967040  ;;  %s420_s0 = scalar_lea.vmem [#allocation6], %s1338_s21  ;;  %s426_s25 = scalar_lea.sflag [#allocation8], %s398_s20 }
  0x5a   : > { %s429_s27 = scalar_lea.vmem [#allocation7], %s1338_s21 }
  0x5b   : > { %1132 = dma.done.wait (%p1257_p7), %s426_s25, 128  }
  0x5c   : > { %1134 = vsyncadd (%p1257_p7), %s426_s25, 4294967168  ;;  %v1163_v0 = vmov 0.0   ;;  %vm1164_vm0 = vmmov 0   ;;  %v1165_v1 = vmov 0   ;;  %v496_v2 = vld [vmem:[%s402_s23] sm:$0xff]  ;;  %vm502_vm1 = vcmask 1043456  }
  0x5d   : > { %889 = vmatprep.subr.bf16.mxu0 %v1163_v0  ;;  %895 = vmatprep.subr.bf16.mxu1 %v1163_v0  ;;  %v548_v3 = vld [vmem:[%s411_s26] sm:$0xff]  ;;  %v497_v4 = vpack.c.bf16 %v496_v2, %v496_v2  ;;  %v598_v6 = vld [vmem:[%s420_s0] sm:$0xff]  ;;  %vm498_vm2 = vcmask 64512   ;;  %p481_p7 = scmp.lt.s32.totalorder %s1149_s12, 1  ;;  %vm698_vm3 = vcmask 518144  }
  0x5e   : > { %891 = vmatprep.mubr.msk.bf16.mxu0 %vm1164_vm0, %v1163_v0  ;;  %897 = vmatprep.mubr.msk.bf16.mxu1 %vm1164_vm0, %v1163_v0  ;;  %v549_v5 = vpack.c.bf16 %v548_v3, %v548_v3  ;;  %v648_v7 = vld [vmem:[%s429_s27] sm:$0xff]  ;;  %v599_v8 = vpack.c.bf16 %v598_v6, %v598_v6  ;;  %v489_v10 = vld [vmem:[%s1412_s8] sm:$0x1f]  ;;  %vm699_vm4 = vsmask.f32 2304 }
  0x5f   : > { %986 = vset.pattern.permute.xlu0 %v1165_v1  ;;  %v649_v9 = vpack.c.bf16 %v648_v7, %v648_v7  ;;  %v504_v11 = vsel %vm502_vm1, %v497_v4, 0  ;;  %v495_v13 = vld [vmem:[%s1408_s4] sm:$0x7]  ;;  %s1438_s12 = smov (!%p481_p7, %s1149_s12), 1  ;;  %vm700_vm5 = vmand %vm698_vm3, %vm699_vm4 }
  0x60   : > { %v554_v12 = vsel %vm502_vm1, %v549_v5, 0  ;;  %492 = vperm.xlu0 %986, %v489_v10   ;;  %890 = vmatpush3.bf16.msra.mxu0 %v504_v11  ;;  %v547_v14 = vld [vmem:[%s1409_s5] sm:$0x7]  ;;  %v604_v15 = vsel %vm502_vm1, %v599_v8, 0  ;;  %s874_s22 = sshll.u32 %s1438_s12, 2 }
  0x61   : > { %896 = vmatpush3.bf16.msra.mxu1 %v554_v12  ;;  %901 = vmatprep.subr.bf16.mxu0 %v1163_v0  ;;  %v654_v16 = vsel %vm502_vm1, %v649_v9, 0  ;;  %v597_v17 = vld [vmem:[%s1410_s6] sm:$0x7]  ;;  %s487_s24 = scalar_lea.vmem %s1413_s9, %s874_s22 }
  0x62   : > { %907 = vmatprep.subr.bf16.mxu1 %v1163_v0  ;;  %v647_v18 = vld [vmem:[%s1411_s7] sm:$0x7] }
  0x63   : > { %892 = vmatmul.mubr.msk.bf16.vlgmr.msra.gmra.mxu0 %vm498_vm2, %v495_v13  ;;  %v701_v36 = vld [vmem:[%s487_s24] sm:$0x7] }
  0x64   : > { %898 = vmatmul.mubr.msk.bf16.vlgmr.msra.gmra.mxu1 %vm498_vm2, %v547_v14  ;;  %902 = vmatpush3.bf16.msra.mxu0 %v604_v15 }
  0x65   : > { %908 = vmatpush3.bf16.msra.mxu1 %v654_v16  ;;  %903 = vmatprep.mubr.msk.bf16.mxu0 %vm1164_vm0, %v1163_v0 }
  0x66   : > { %909 = vmatprep.mubr.msk.bf16.mxu1 %vm1164_vm0, %v1163_v0 }
  0x6b   : > { %904 = vmatmul.mubr.msk.bf16.vlgmr.msra.gmra.mxu0 %vm498_vm2, %v597_v17 }
  0x6c   : > { %910 = vmatmul.mubr.msk.bf16.vlgmr.msra.gmra.mxu1 %vm498_vm2, %v647_v18 }
  0xdb   : > { %v493_v19 = vpop.permute.xlu0 %492 }
 0x123   : > { %v540_v20 = vpop.f32.mrf.mxu0 }
 0x124   : > { %v590_v21 = vpop.f32.mrf.mxu1  ;;  %v546_v24 = vadd.f32 %v540_v20, %v493_v19 }
 0x125   : > { %v893_v22 = vpop.f32.mrf.mxu0 }
 0x126   : > { %v899_v23 = vpop.f32.mrf.mxu1  ;;  %v596_v29 = vadd.f32 %v590_v21, %v546_v24 }
 0x127   : > { %v543_v25 = vpop.f32.mrf.mxu0 }
 0x128   : > { %v593_v26 = vpop.f32.mrf.mxu1 }
 0x129   : > { %v894_v27 = vpop.f32.mrf.mxu0 }
 0x12a   : > { %v900_v28 = vpop.f32.mrf.mxu1 }
 0x12b   : > { %v640_v30 = vpop.f32.mrf.mxu0 }
 0x12c   : > { %v690_v31 = vpop.f32.mrf.mxu1  ;;  %v646_v32 = vadd.f32 %v640_v30, %v596_v29 }
 0x12d   : > { %v905_v33 = vpop.f32.mrf.mxu0 }
 0x12e   : > { %v911_v34 = vpop.f32.mrf.mxu1  ;;  %v696_v35 = vadd.f32 %v690_v31, %v646_v32 }
 0x12f   : > { %v643_v37 = vpop.f32.mrf.mxu0 }
 0x130   : > { %v693_v38 = vpop.f32.mrf.mxu1  ;;  %v697_v39 = vpack.c.bf16 %v696_v35, %v696_v35 }
 0x131   : > { %v906_v40 = vpop.f32.mrf.mxu0 }
 0x132   : > { %v912_v41 = vpop.f32.mrf.mxu1  ;;  %v702_v42 = vsel %vm700_vm5, %v697_v39, %v701_v36 }
 0x133   : > { %703 = vst [vmem:[%s487_s24] sm:$0x7] %v702_v42 }
 0x134 PF: > { %s28_s14 = sadd.s32 1, %s1157_s14   ;;  %s1428_s12 = sld [smem:[#allocation14_spill]] }
 0x135   : > { %p25_p9 = scmp.ge.s32.totalorder %s28_s14, 4   ;;  %s1429_s15 = sld [smem:[#allocation12_spill]] }
 0x136   : > { %s1430_s13 = sld [smem:[#allocation13_spill]]  ;;  %s1431_s30 = smov %s1141_s10 }
 0x137   : > { %s1432_s10 = smov %s1145_s11  ;;  %27 = sbr.rel (!%p25_p9) target bundleno = 11 (0xb), region = 133 }
 0x13a   : > { %s1433_s11 = smov %s1428_s12 }
 0x13b   : > { %s1434_s12 = smov %s1429_s15 }
 0x13c   :  { %729 = vsyncpa [#allocation3], 1 }
 0x13d   :  { %731 = vsyncpa [#allocation3 + $0x1], 1 }
 0x13e   :  { %732 = vsyncpa [#allocation5], 1 }
 0x13f   :  { %734 = vsyncpa [#allocation5 + $0x1], 1 }
 0x140   :  { %735 = vsyncpa [#allocation8], 1 }
 0x141   :  { %737 = vsyncpa [#allocation8 + $0x1], 1 }

</bundles_post_ra>
